<compile_context>
chip_gen: v7x
topology: tpu7x:2x2x1
jax: 0.10.0
libtpu: 0.0.40
codegen_flags: <defaults>
</compile_context>

<pallas_src>
import jax
import jax.numpy as jnp
from jax.experimental import pallas as pl
from jax.experimental.pallas import tpu as pltpu

BN_EPS = 1e-5  # nn.BatchNorm2d default

# MXU operand dtype.  bf16 halves operand DMA/VMEM bytes and runs the MXU at
# its native rate once channel counts are realistic (>=64).  At this module's
# toy channels (Cin=4, Cout=8) the MXU is padding-bound either way, and f32
# keeps exact (<=1e-3) parity with the f32 reference, so f32 is the default.
MATMUL_DTYPE = jnp.float32

_VMEM_LIMIT_BYTES = 32 * 1024 * 1024  # safe on v5e / v6e / v7x


def _compiler_params():
    return pltpu.CompilerParams(
        dimension_semantics=("parallel",),      # batch axis: independent blocks
        vmem_limit_bytes=_VMEM_LIMIT_BYTES,
    )


# ---------------------------------------------------------------------------
# Shared inner loop: valid 3x3 conv (9 shifted MXU dots / output row) + stats
# ---------------------------------------------------------------------------
def _conv3x3_rows(read_patch, w_ref, y_ref, stats_ref):
    """read_patch(oh, kh, kw) -> (OW, Cin) input slice for tap (kh, kw) of
    output row `oh`.  w_ref: (3, 3, Cin, Cout).  Writes y_ref[0, oh] per row
    (raw, pre-BN conv output) and stats_ref[0] = [sum_c ; sum_sq_c]."""
    _, OH, OW, Cout = y_ref.shape

    def row_body(oh, carry):
        s, sq = carry                                    # (1, Cout) f32 each
        acc = jnp.zeros((OW, Cout), jnp.float32)
        for kh in range(3):                              # 3x3 taps: static
            for kw in range(3):
                patch = read_patch(oh, kh, kw)           # (OW, Cin)
                acc += jnp.dot(patch.astype(MATMUL_DTYPE),
                               w_ref[kh, kw].astype(MATMUL_DTYPE),
                               preferred_element_type=jnp.float32)
        y_ref[0, oh] = acc
        s = s + jnp.sum(acc, axis=0, keepdims=True)
        sq = sq + jnp.sum(acc * acc, axis=0, keepdims=True)
        return s, sq

    zero = jnp.zeros((1, Cout), jnp.float32)
    s, sq = jax.lax.fori_loop(0, OH, row_body, (zero, zero))
    stats_ref[0, 0:1, :] = s
    stats_ref[0, 1:2, :] = sq


# ---------------------------------------------------------------------------
# Kernel 1: conv1 (bias dropped) + per-image channel stats
# ---------------------------------------------------------------------------
def _conv1_kernel(x_ref, w_ref, y_ref, stats_ref):
    # x_ref: (1, H, W, Cin) image block resident in VMEM.
    _, _, OW, _ = y_ref.shape

    def read_patch(oh, kh, kw):
        return x_ref[0, oh + kh, pl.ds(kw, OW), :]

    _conv3x3_rows(read_patch, w_ref, y_ref, stats_ref)


# ---------------------------------------------------------------------------
# Kernel 2: BN1+ReLU1 (fused, into VMEM scratch) + conv2 + per-image stats
# ---------------------------------------------------------------------------
def _bnrelu_conv2_kernel(y1_ref, scale_ref, shift_ref, w_ref,
                         y2_ref, stats_ref, act_ref):
    # y1_ref: (1, H1, W1, C) raw conv1 output.  Normalize+ReLU it ONCE into
    # VMEM scratch (single fused FMA+ReLU sweep, f32 - post-BN activation
    # never hits HBM), then run conv2 directly out of the scratch.
    _, H1, _, _ = y1_ref.shape
    _, _, OW, _ = y2_ref.shape
    sc = scale_ref[...]                                  # (1, C)
    sh = shift_ref[...]                                  # (1, C)

    def norm_row(h, carry):
        act_ref[h] = jnp.maximum(y1_ref[0, h] * sc + sh, 0.0)
        return carry

    jax.lax.fori_loop(0, H1, norm_row, 0)

    def read_patch(oh, kh, kw):
        return act_ref[oh + kh, pl.ds(kw, OW), :]

    _conv3x3_rows(read_patch, w_ref, y2_ref, stats_ref)


# ---------------------------------------------------------------------------
# Kernel 3: final BN2 + ReLU2 (per-channel scale/shift precomputed)
# ---------------------------------------------------------------------------
def _bnrelu_kernel(y_ref, scale_ref, shift_ref, o_ref):
    _, OH, _, _ = y_ref.shape
    sc = scale_ref[...]
    sh = shift_ref[...]

    def row(h, carry):
        o_ref[0, h] = jnp.maximum(y_ref[0, h] * sc + sh, 0.0)
        return carry

    jax.lax.fori_loop(0, OH, row, 0)


# ---------------------------------------------------------------------------
# pallas_call wrappers (grid over batch, per-image blocks)
# ---------------------------------------------------------------------------
def _conv_block1(x_nhwc, w_hwio):
    N, H, W, Cin = x_nhwc.shape
    Cout = w_hwio.shape[-1]
    OH, OW = H - 2, W - 2
    return pl.pallas_call(
        _conv1_kernel,
        grid=(N,),
        in_specs=[
            pl.BlockSpec((1, H, W, Cin), lambda n: (n, 0, 0, 0)),
            pl.BlockSpec((3, 3, Cin, Cout), lambda n: (0, 0, 0, 0)),
        ],
        out_specs=(
            pl.BlockSpec((1, OH, OW, Cout), lambda n: (n, 0, 0, 0)),
            pl.BlockSpec((1, 2, Cout), lambda n: (n, 0, 0)),
        ),
        out_shape=(
            jax.ShapeDtypeStruct((N, OH, OW, Cout), jnp.float32),
            jax.ShapeDtypeStruct((N, 2, Cout), jnp.float32),
        ),
        compiler_params=_compiler_params(),
    )(x_nhwc, w_hwio)


def _conv_block2(y1_raw, scale1, shift1, w_hwio):
    N, H1, W1, C = y1_raw.shape
    Cout = w_hwio.shape[-1]
    OH, OW = H1 - 2, W1 - 2
    return pl.pallas_call(
        _bnrelu_conv2_kernel,
        grid=(N,),
        in_specs=[
            pl.BlockSpec((1, H1, W1, C), lambda n: (n, 0, 0, 0)),
            pl.BlockSpec((1, C), lambda n: (0, 0)),
            pl.BlockSpec((1, C), lambda n: (0, 0)),
            pl.BlockSpec((3, 3, C, Cout), lambda n: (0, 0, 0, 0)),
        ],
        out_specs=(
            pl.BlockSpec((1, OH, OW, Cout), lambda n: (n, 0, 0, 0)),
            pl.BlockSpec((1, 2, Cout), lambda n: (n, 0, 0)),
        ),
        out_shape=(
            jax.ShapeDtypeStruct((N, OH, OW, Cout), jnp.float32),
            jax.ShapeDtypeStruct((N, 2, Cout), jnp.float32),
        ),
        scratch_shapes=[pltpu.VMEM((H1, W1, C), jnp.float32)],
        compiler_params=_compiler_params(),
    )(y1_raw, scale1, shift1, w_hwio)


def _bn_relu_block(y_raw, scale, shift):
    N, OH, OW, C = y_raw.shape
    return pl.pallas_call(
        _bnrelu_kernel,
        grid=(N,),
        in_specs=[
            pl.BlockSpec((1, OH, OW, C), lambda n: (n, 0, 0, 0)),
            pl.BlockSpec((1, C), lambda n: (0, 0)),
            pl.BlockSpec((1, C), lambda n: (0, 0)),
        ],
        out_specs=pl.BlockSpec((1, OH, OW, C), lambda n: (n, 0, 0, 0)),
        out_shape=jax.ShapeDtypeStruct((N, OH, OW, C), jnp.float32),
        compiler_params=_compiler_params(),
    )(y_raw, scale, shift)


def _bn_scale_shift(partial_stats, count, gamma, beta):
    # partial_stats: (N, 2, C) per-image [sum, sum_sq]; count = N*OH*OW.
    # Tiny (C,)-sized finalize in plain JAX (f32 accumulation throughout).
    total = jnp.sum(partial_stats, axis=0)                  # (2, C)
    mean = total[0] / count
    var = total[1] / count - mean * mean                    # biased var (training BN)
    scale = gamma * jax.lax.rsqrt(var + BN_EPS)             # gamma folded into scale
    shift = beta - mean * scale                             # conv bias omitted: BN mean
    #                                                         subtraction cancels it exactly
    return (scale.reshape(1, -1).astype(jnp.float32),
            shift.reshape(1, -1).astype(jnp.float32))


def double_conv_orig_forward(x_nchw, params):
    # Layout changes only at the module boundary; everything between blocks
    # stays NHWC (channels on the lane axis), no intermediate reshapes.
    x = jnp.transpose(x_nchw, (0, 2, 3, 1)).astype(jnp.float32)
    N, H, W, _ = x.shape
    w1 = jnp.transpose(params["w1"], (2, 3, 1, 0))          # OIHW -> HWIO
    w2 = jnp.transpose(params["w2"], (2, 3, 1, 0))
    # params["b1"] / params["b2"] intentionally not passed to the kernels:
    # a per-channel conv bias is exactly cancelled by training-mode BN.

    y1_raw, st1 = _conv_block1(x, w1)
    scale1, shift1 = _bn_scale_shift(st1, N * (H - 2) * (W - 2),
                                     params["g1"], params["beta1"])
    y2_raw, st2 = _conv_block2(y1_raw, scale1, shift1, w2)
    scale2, shift2 = _bn_scale_shift(st2, N * (H - 4) * (W - 4),
                                     params["g2"], params["beta2"])
    out = _bn_relu_block(y2_raw, scale2, shift2)
    return jnp.transpose(out, (0, 3, 1, 2))                 # NHWC -> NCHW (boundary)


# ---------------------------------------------------------------------------
# Pure-JAX reference (training-mode BN, conv bias included) for correctness
# ---------------------------------------------------------------------------
def _reference(x_nchw, params):
    def conv(x, w, b):
        y = jax.lax.conv_general_dilated(
            x, w, (1, 1), "VALID", dimension_numbers=("NCHW", "OIHW", "NCHW"))
        return y + b.reshape(1, -1, 1, 1)

    def bn_relu(x, g, beta):
        mean = jnp.mean(x, axis=(0, 2, 3), keepdims=True)
        var = jnp.mean((x - mean) ** 2, axis=(0, 2, 3), keepdims=True)
        y = (x - mean) * jax.lax.rsqrt(var + BN_EPS)
        y = y * g.reshape(1, -1, 1, 1) + beta.reshape(1, -1, 1, 1)
        return jnp.maximum(y, 0.0)

    y = bn_relu(conv(x_nchw, params["w1"], params["b1"]), params["g1"], params["beta1"])
    y = bn_relu(conv(y, params["w2"], params["b2"]), params["g2"], params["beta2"])
    return y


# ---------------------------------------------------------------------------
if __name__ == "__main__":
    in_ch, out_ch = 4, 8
    N, H, W = 2, 16, 16

    key = jax.random.PRNGKey(0)
    kx, kw1, kb1, kw2, kb2, kg1, kbe1 = jax.random.split(key, 7)

    x = jax.random.normal(kx, (N, in_ch, H, W), dtype=jnp.float32)

    params = {
        # Conv2d(in_ch, out_ch, 3): weight (Cout, Cin, 3, 3), bias (Cout,)
        "w1": jax.random.normal(kw1, (out_ch, in_ch, 3, 3), jnp.float32) * 0.1,
        "b1": jax.random.normal(kb1, (out_ch,), jnp.float32) * 0.1,
        # BatchNorm2d affine params (non-trivial to exercise the folded path)
        "g1": 1.0 + 0.1 * jax.random.normal(kg1, (out_ch,), jnp.float32),
        "beta1": 0.1 * jax.random.normal(kbe1, (out_ch,), jnp.float32),
        # Conv2d(out_ch, out_ch, 3)
        "w2": jax.random.normal(kw2, (out_ch, out_ch, 3, 3), jnp.float32) * 0.1,
        "b2": jax.random.normal(kb2, (out_ch,), jnp.float32) * 0.1,
        "g2": jnp.ones((out_ch,), jnp.float32),
        "beta2": jnp.zeros((out_ch,), jnp.float32),
    }

    fwd = jax.jit(double_conv_orig_forward)
    out = jax.block_until_ready(fwd(x, params))
    ref = jax.block_until_ready(_reference(x, params))

    assert out.shape == (N, out_ch, H - 4, W - 4), out.shape
    max_diff = jnp.max(jnp.abs(out - ref))
    assert jnp.allclose(out, ref, atol=1e-3, rtol=1e-3), f"max abs diff = {max_diff}"

    print("KERNEL_OK")
</pallas_src>

<mosaic_0001>
module attributes {stable_mosaic.version = 11 : i64} {
  func.func @_conv1_kernel(%arg0: i32, %arg1: memref<1x16x16x4xf32, #tpu.memory_space<vmem>>, %arg2: memref<3x3x4x8xf32, #tpu.memory_space<vmem>>, %arg3: memref<1x14x14x8xf32, #tpu.memory_space<vmem>>, %arg4: memref<1x2x8xf32, #tpu.memory_space<vmem>>) attributes {dimension_semantics = [#tpu.dimension_semantics<parallel>], iteration_bounds = array<i64: 2>, scalar_prefetch = 0 : i64, scratch_operands = 0 : i64, tpu.core_type = #tpu.core_type<tc>, window_params = [{transform_indices = @transform_0, window_bounds = array<i64: 1, 16, 16, 4>}, {pipeline_mode = #tpu.pipeline_mode<synchronous>, transform_indices = @transform_1, window_bounds = array<i64: 3, 3, 4, 8>}, {transform_indices = @transform_2, window_bounds = array<i64: 1, 14, 14, 8>}, {transform_indices = @transform_3, window_bounds = array<i64: 1, 2, 8>}]} {
    %cst = arith.constant 0.000000e+00 : f32
    %0 = vector.broadcast %cst : f32 to vector<1x8xf32>
    %c0_i32 = arith.constant 0 : i32
    %c14_i32 = arith.constant 14 : i32
    %1 = arith.addi %c0_i32, %c14_i32 : i32
    %c1_i32 = arith.constant 1 : i32
    %2:2 = scf.for %arg5 = %c0_i32 to %1 step %c1_i32 iter_args(%arg6 = %0, %arg7 = %0) -> (vector<1x8xf32>, vector<1x8xf32>)  : i32 {
      %cst_5 = arith.constant 0.000000e+00 : f32
      %9 = vector.broadcast %cst_5 : f32 to vector<14x8xf32>
      %c0_i32_6 = arith.constant 0 : i32
      %10 = arith.addi %arg5, %c0_i32_6 : i32
      %c0_7 = arith.constant 0 : index
      %11 = arith.index_cast %10 : i32 to index
      %c0_8 = arith.constant 0 : index
      %c0_9 = arith.constant 0 : index
      %12 = vector.load %arg1[%c0_7, %11, %c0_8, %c0_9] : memref<1x16x16x4xf32, #tpu.memory_space<vmem>>, vector<1x1x14x4xf32>
      %13 = vector.shape_cast %12 : vector<1x1x14x4xf32> to vector<14x4xf32>
      %c0_10 = arith.constant 0 : index
      %c0_11 = arith.constant 0 : index
      %c0_12 = arith.constant 0 : index
      %c0_13 = arith.constant 0 : index
      %14 = vector.load %arg2[%c0_10, %c0_11, %c0_12, %c0_13] : memref<3x3x4x8xf32, #tpu.memory_space<vmem>>, vector<1x1x4x8xf32>
      %15 = vector.shape_cast %14 : vector<1x1x4x8xf32> to vector<4x8xf32>
      %cst_14 = arith.constant dense<0.000000e+00> : vector<14x8xf32>
      %16 = tpu.matmul %13, %15, %cst_14 {dimension_numbers = #tpu.dot_dimension_numbers<[1], [0], [0], [1], [0, 0, 1, 1], [], []>} : vector<14x4xf32>, vector<4x8xf32>, vector<14x8xf32> -> vector<14x8xf32>
      %17 = arith.addf %9, %16 : vector<14x8xf32>
      %c0_i32_15 = arith.constant 0 : i32
      %18 = arith.addi %arg5, %c0_i32_15 : i32
      %c0_16 = arith.constant 0 : index
      %19 = arith.index_cast %18 : i32 to index
      %c1_17 = arith.constant 1 : index
      %c0_18 = arith.constant 0 : index
      %20 = vector.load %arg1[%c0_16, %19, %c1_17, %c0_18] : memref<1x16x16x4xf32, #tpu.memory_space<vmem>>, vector<1x1x14x4xf32>
      %21 = vector.shape_cast %20 : vector<1x1x14x4xf32> to vector<14x4xf32>
      %c0_19 = arith.constant 0 : index
      %c1_20 = arith.constant 1 : index
      %c0_21 = arith.constant 0 : index
      %c0_22 = arith.constant 0 : index
      %22 = vector.load %arg2[%c0_19, %c1_20, %c0_21, %c0_22] : memref<3x3x4x8xf32, #tpu.memory_space<vmem>>, vector<1x1x4x8xf32>
      %23 = vector.shape_cast %22 : vector<1x1x4x8xf32> to vector<4x8xf32>
      %cst_23 = arith.constant dense<0.000000e+00> : vector<14x8xf32>
      %24 = tpu.matmul %21, %23, %cst_23 {dimension_numbers = #tpu.dot_dimension_numbers<[1], [0], [0], [1], [0, 0, 1, 1], [], []>} : vector<14x4xf32>, vector<4x8xf32>, vector<14x8xf32> -> vector<14x8xf32>
      %25 = arith.addf %17, %24 : vector<14x8xf32>
      %c0_i32_24 = arith.constant 0 : i32
      %26 = arith.addi %arg5, %c0_i32_24 : i32
      %c0_25 = arith.constant 0 : index
      %27 = arith.index_cast %26 : i32 to index
      %c2 = arith.constant 2 : index
      %c0_26 = arith.constant 0 : index
      %28 = vector.load %arg1[%c0_25, %27, %c2, %c0_26] : memref<1x16x16x4xf32, #tpu.memory_space<vmem>>, vector<1x1x14x4xf32>
      %29 = vector.shape_cast %28 : vector<1x1x14x4xf32> to vector<14x4xf32>
      %c0_27 = arith.constant 0 : index
      %c2_28 = arith.constant 2 : index
      %c0_29 = arith.constant 0 : index
      %c0_30 = arith.constant 0 : index
      %30 = vector.load %arg2[%c0_27, %c2_28, %c0_29, %c0_30] : memref<3x3x4x8xf32, #tpu.memory_space<vmem>>, vector<1x1x4x8xf32>
      %31 = vector.shape_cast %30 : vector<1x1x4x8xf32> to vector<4x8xf32>
      %cst_31 = arith.constant dense<0.000000e+00> : vector<14x8xf32>
      %32 = tpu.matmul %29, %31, %cst_31 {dimension_numbers = #tpu.dot_dimension_numbers<[1], [0], [0], [1], [0, 0, 1, 1], [], []>} : vector<14x4xf32>, vector<4x8xf32>, vector<14x8xf32> -> vector<14x8xf32>
      %33 = arith.addf %25, %32 : vector<14x8xf32>
      %c1_i32_32 = arith.constant 1 : i32
      %34 = arith.addi %arg5, %c1_i32_32 : i32
      %c0_33 = arith.constant 0 : index
      %35 = arith.index_cast %34 : i32 to index
      %c0_34 = arith.constant 0 : index
      %c0_35 = arith.constant 0 : index
      %36 = vector.load %arg1[%c0_33, %35, %c0_34, %c0_35] : memref<1x16x16x4xf32, #tpu.memory_space<vmem>>, vector<1x1x14x4xf32>
      %37 = vector.shape_cast %36 : vector<1x1x14x4xf32> to vector<14x4xf32>
      %c1_36 = arith.constant 1 : index
      %c0_37 = arith.constant 0 : index
      %c0_38 = arith.constant 0 : index
      %c0_39 = arith.constant 0 : index
      %38 = vector.load %arg2[%c1_36, %c0_37, %c0_38, %c0_39] : memref<3x3x4x8xf32, #tpu.memory_space<vmem>>, vector<1x1x4x8xf32>
      %39 = vector.shape_cast %38 : vector<1x1x4x8xf32> to vector<4x8xf32>
      %cst_40 = arith.constant dense<0.000000e+00> : vector<14x8xf32>
      %40 = tpu.matmul %37, %39, %cst_40 {dimension_numbers = #tpu.dot_dimension_numbers<[1], [0], [0], [1], [0, 0, 1, 1], [], []>} : vector<14x4xf32>, vector<4x8xf32>, vector<14x8xf32> -> vector<14x8xf32>
      %41 = arith.addf %33, %40 : vector<14x8xf32>
      %c1_i32_41 = arith.constant 1 : i32
      %42 = arith.addi %arg5, %c1_i32_41 : i32
      %c0_42 = arith.constant 0 : index
      %43 = arith.index_cast %42 : i32 to index
      %c1_43 = arith.constant 1 : index
      %c0_44 = arith.constant 0 : index
      %44 = vector.load %arg1[%c0_42, %43, %c1_43, %c0_44] : memref<1x16x16x4xf32, #tpu.memory_space<vmem>>, vector<1x1x14x4xf32>
      %45 = vector.shape_cast %44 : vector<1x1x14x4xf32> to vector<14x4xf32>
      %c1_45 = arith.constant 1 : index
      %c1_46 = arith.constant 1 : index
      %c0_47 = arith.constant 0 : index
      %c0_48 = arith.constant 0 : index
      %46 = vector.load %arg2[%c1_45, %c1_46, %c0_47, %c0_48] : memref<3x3x4x8xf32, #tpu.memory_space<vmem>>, vector<1x1x4x8xf32>
      %47 = vector.shape_cast %46 : vector<1x1x4x8xf32> to vector<4x8xf32>
      %cst_49 = arith.constant dense<0.000000e+00> : vector<14x8xf32>
      %48 = tpu.matmul %45, %47, %cst_49 {dimension_numbers = #tpu.dot_dimension_numbers<[1], [0], [0], [1], [0, 0, 1, 1], [], []>} : vector<14x4xf32>, vector<4x8xf32>, vector<14x8xf32> -> vector<14x8xf32>
      %49 = arith.addf %41, %48 : vector<14x8xf32>
      %c1_i32_50 = arith.constant 1 : i32
      %50 = arith.addi %arg5, %c1_i32_50 : i32
      %c0_51 = arith.constant 0 : index
      %51 = arith.index_cast %50 : i32 to index
      %c2_52 = arith.constant 2 : index
      %c0_53 = arith.constant 0 : index
      %52 = vector.load %arg1[%c0_51, %51, %c2_52, %c0_53] : memref<1x16x16x4xf32, #tpu.memory_space<vmem>>, vector<1x1x14x4xf32>
      %53 = vector.shape_cast %52 : vector<1x1x14x4xf32> to vector<14x4xf32>
      %c1_54 = arith.constant 1 : index
      %c2_55 = arith.constant 2 : index
      %c0_56 = arith.constant 0 : index
      %c0_57 = arith.constant 0 : index
      %54 = vector.load %arg2[%c1_54, %c2_55, %c0_56, %c0_57] : memref<3x3x4x8xf32, #tpu.memory_space<vmem>>, vector<1x1x4x8xf32>
      %55 = vector.shape_cast %54 : vector<1x1x4x8xf32> to vector<4x8xf32>
      %cst_58 = arith.constant dense<0.000000e+00> : vector<14x8xf32>
      %56 = tpu.matmul %53, %55, %cst_58 {dimension_numbers = #tpu.dot_dimension_numbers<[1], [0], [0], [1], [0, 0, 1, 1], [], []>} : vector<14x4xf32>, vector<4x8xf32>, vector<14x8xf32> -> vector<14x8xf32>
      %57 = arith.addf %49, %56 : vector<14x8xf32>
      %c2_i32 = arith.constant 2 : i32
      %58 = arith.addi %arg5, %c2_i32 : i32
      %c0_59 = arith.constant 0 : index
      %59 = arith.index_cast %58 : i32 to index
      %c0_60 = arith.constant 0 : index
      %c0_61 = arith.constant 0 : index
      %60 = vector.load %arg1[%c0_59, %59, %c0_60, %c0_61] : memref<1x16x16x4xf32, #tpu.memory_space<vmem>>, vector<1x1x14x4xf32>
      %61 = vector.shape_cast %60 : vector<1x1x14x4xf32> to vector<14x4xf32>
      %c2_62 = arith.constant 2 : index
      %c0_63 = arith.constant 0 : index
      %c0_64 = arith.constant 0 : index
      %c0_65 = arith.constant 0 : index
      %62 = vector.load %arg2[%c2_62, %c0_63, %c0_64, %c0_65] : memref<3x3x4x8xf32, #tpu.memory_space<vmem>>, vector<1x1x4x8xf32>
      %63 = vector.shape_cast %62 : vector<1x1x4x8xf32> to vector<4x8xf32>
      %cst_66 = arith.constant dense<0.000000e+00> : vector<14x8xf32>
      %64 = tpu.matmul %61, %63, %cst_66 {dimension_numbers = #tpu.dot_dimension_numbers<[1], [0], [0], [1], [0, 0, 1, 1], [], []>} : vector<14x4xf32>, vector<4x8xf32>, vector<14x8xf32> -> vector<14x8xf32>
      %65 = arith.addf %57, %64 : vector<14x8xf32>
      %c2_i32_67 = arith.constant 2 : i32
      %66 = arith.addi %arg5, %c2_i32_67 : i32
      %c0_68 = arith.constant 0 : index
      %67 = arith.index_cast %66 : i32 to index
      %c1_69 = arith.constant 1 : index
      %c0_70 = arith.constant 0 : index
      %68 = vector.load %arg1[%c0_68, %67, %c1_69, %c0_70] : memref<1x16x16x4xf32, #tpu.memory_space<vmem>>, vector<1x1x14x4xf32>
      %69 = vector.shape_cast %68 : vector<1x1x14x4xf32> to vector<14x4xf32>
      %c2_71 = arith.constant 2 : index
      %c1_72 = arith.constant 1 : index
      %c0_73 = arith.constant 0 : index
      %c0_74 = arith.constant 0 : index
      %70 = vector.load %arg2[%c2_71, %c1_72, %c0_73, %c0_74] : memref<3x3x4x8xf32, #tpu.memory_space<vmem>>, vector<1x1x4x8xf32>
      %71 = vector.shape_cast %70 : vector<1x1x4x8xf32> to vector<4x8xf32>
      %cst_75 = arith.constant dense<0.000000e+00> : vector<14x8xf32>
      %72 = tpu.matmul %69, %71, %cst_75 {dimension_numbers = #tpu.dot_dimension_numbers<[1], [0], [0], [1], [0, 0, 1, 1], [], []>} : vector<14x4xf32>, vector<4x8xf32>, vector<14x8xf32> -> vector<14x8xf32>
      %73 = arith.addf %65, %72 : vector<14x8xf32>
      %c2_i32_76 = arith.constant 2 : i32
      %74 = arith.addi %arg5, %c2_i32_76 : i32
      %c0_77 = arith.constant 0 : index
      %75 = arith.index_cast %74 : i32 to index
      %c2_78 = arith.constant 2 : index
      %c0_79 = arith.constant 0 : index
      %76 = vector.load %arg1[%c0_77, %75, %c2_78, %c0_79] : memref<1x16x16x4xf32, #tpu.memory_space<vmem>>, vector<1x1x14x4xf32>
      %77 = vector.shape_cast %76 : vector<1x1x14x4xf32> to vector<14x4xf32>
      %c2_80 = arith.constant 2 : index
      %c2_81 = arith.constant 2 : index
      %c0_82 = arith.constant 0 : index
      %c0_83 = arith.constant 0 : index
      %78 = vector.load %arg2[%c2_80, %c2_81, %c0_82, %c0_83] : memref<3x3x4x8xf32, #tpu.memory_space<vmem>>, vector<1x1x4x8xf32>
      %79 = vector.shape_cast %78 : vector<1x1x4x8xf32> to vector<4x8xf32>
      %cst_84 = arith.constant dense<0.000000e+00> : vector<14x8xf32>
      %80 = tpu.matmul %77, %79, %cst_84 {dimension_numbers = #tpu.dot_dimension_numbers<[1], [0], [0], [1], [0, 0, 1, 1], [], []>} : vector<14x4xf32>, vector<4x8xf32>, vector<14x8xf32> -> vector<14x8xf32>
      %81 = arith.addf %73, %80 : vector<14x8xf32>
      %c0_85 = arith.constant 0 : index
      %82 = arith.index_cast %arg5 : i32 to index
      %c0_86 = arith.constant 0 : index
      %c0_87 = arith.constant 0 : index
      %83 = vector.load %arg3[%c0_85, %82, %c0_86, %c0_87] : memref<1x14x14x8xf32, #tpu.memory_space<vmem>>, vector<1x1x14x8xf32>
      %84 = vector.shape_cast %83 : vector<1x1x14x8xf32> to vector<14x8xf32>
      %85 = vector.shape_cast %81 : vector<14x8xf32> to vector<1x1x14x8xf32>
      tpu.vector_store %arg3[%c0_85, %82, %c0_86, %c0_87], %85 {strides = array<i32>} : memref<1x14x14x8xf32, #tpu.memory_space<vmem>>, vector<1x1x14x8xf32>,
      %cst_88 = arith.constant dense<0.000000e+00> : vector<8xf32>
      %86 = vector.multi_reduction <add>, %81, %cst_88 [0] : vector<14x8xf32> to vector<8xf32>
      %87 = vector.shape_cast %86 : vector<8xf32> to vector<1x8xf32>
      %88 = arith.addf %arg6, %87 : vector<1x8xf32>
      %89 = arith.mulf %81, %81 : vector<14x8xf32>
      %cst_89 = arith.constant dense<0.000000e+00> : vector<8xf32>
      %90 = vector.multi_reduction <add>, %89, %cst_89 [0] : vector<14x8xf32> to vector<8xf32>
      %91 = vector.shape_cast %90 : vector<8xf32> to vector<1x8xf32>
      %92 = arith.addf %arg7, %91 : vector<1x8xf32>
      scf.yield %88, %92 : vector<1x8xf32>, vector<1x8xf32>
    }
    %c14_i32_0 = arith.constant 14 : i32
    %c0 = arith.constant 0 : index
    %c0_1 = arith.constant 0 : index
    %c0_2 = arith.constant 0 : index
    %3 = vector.load %arg4[%c0, %c0_1, %c0_2] : memref<1x2x8xf32, #tpu.memory_space<vmem>>, vector<1x1x8xf32>
    %4 = vector.shape_cast %3 : vector<1x1x8xf32> to vector<1x8xf32>
    %5 = vector.shape_cast %2#0 : vector<1x8xf32> to vector<1x1x8xf32>
    tpu.vector_store %arg4[%c0, %c0_1, %c0_2], %5 {strides = array<i32>} : memref<1x2x8xf32, #tpu.memory_space<vmem>>, vector<1x1x8xf32>,
    %c0_3 = arith.constant 0 : index
    %c1 = arith.constant 1 : index
    %c0_4 = arith.constant 0 : index
    %6 = vector.load %arg4[%c0_3, %c1, %c0_4] : memref<1x2x8xf32, #tpu.memory_space<vmem>>, vector<1x1x8xf32>
    %7 = vector.shape_cast %6 : vector<1x1x8xf32> to vector<1x8xf32>
    %8 = vector.shape_cast %2#1 : vector<1x8xf32> to vector<1x1x8xf32>
    tpu.vector_store %arg4[%c0_3, %c1, %c0_4], %8 {strides = array<i32>} : memref<1x2x8xf32, #tpu.memory_space<vmem>>, vector<1x1x8xf32>,
    return
  }
  func.func @transform_0(%arg0: i32) -> (i32, i32, i32, i32) {
    %c0_i32 = arith.constant 0 : i32
    %c0_i32_0 = arith.constant 0 : i32
    %c0_i32_1 = arith.constant 0 : i32
    %c0_i32_2 = arith.constant 0 : i32
    return %arg0, %c0_i32, %c0_i32_0, %c0_i32_1 : i32, i32, i32, i32
  }
  func.func @transform_1(%arg0: i32) -> (i32, i32, i32, i32) {
    %c0_i32 = arith.constant 0 : i32
    %c0_i32_0 = arith.constant 0 : i32
    %c0_i32_1 = arith.constant 0 : i32
    %c0_i32_2 = arith.constant 0 : i32
    %c0_i32_3 = arith.constant 0 : i32
    return %c0_i32, %c0_i32_0, %c0_i32_1, %c0_i32_2 : i32, i32, i32, i32
  }
  func.func @transform_2(%arg0: i32) -> (i32, i32, i32, i32) {
    %c0_i32 = arith.constant 0 : i32
    %c0_i32_0 = arith.constant 0 : i32
    %c0_i32_1 = arith.constant 0 : i32
    %c0_i32_2 = arith.constant 0 : i32
    return %arg0, %c0_i32, %c0_i32_0, %c0_i32_1 : i32, i32, i32, i32
  }
  func.func @transform_3(%arg0: i32) -> (i32, i32, i32) {
    %c0_i32 = arith.constant 0 : i32
    %c0_i32_0 = arith.constant 0 : i32
    %c0_i32_1 = arith.constant 0 : i32
    return %arg0, %c0_i32, %c0_i32_0 : i32, i32, i32
  }
}

module attributes {stable_mosaic.version = 11 : i64} {
  func.func @_bnrelu_conv2_kernel(%arg0: i32, %arg1: memref<1x14x14x8xf32, #tpu.memory_space<vmem>>, %arg2: memref<1x8xf32, #tpu.memory_space<vmem>>, %arg3: memref<1x8xf32, #tpu.memory_space<vmem>>, %arg4: memref<3x3x8x8xf32, #tpu.memory_space<vmem>>, %arg5: memref<1x12x12x8xf32, #tpu.memory_space<vmem>>, %arg6: memref<1x2x8xf32, #tpu.memory_space<vmem>>, %arg7: memref<14x14x8xf32, #tpu.memory_space<vmem>>) attributes {dimension_semantics = [#tpu.dimension_semantics<parallel>], iteration_bounds = array<i64: 2>, scalar_prefetch = 0 : i64, scratch_operands = 1 : i64, tpu.core_type = #tpu.core_type<tc>, window_params = [{transform_indices = @transform_0, window_bounds = array<i64: 1, 14, 14, 8>}, {pipeline_mode = #tpu.pipeline_mode<synchronous>, transform_indices = @transform_1, window_bounds = array<i64: 1, 8>}, {pipeline_mode = #tpu.pipeline_mode<synchronous>, transform_indices = @transform_2, window_bounds = array<i64: 1, 8>}, {pipeline_mode = #tpu.pipeline_mode<synchronous>, transform_indices = @transform_3, window_bounds = array<i64: 3, 3, 8, 8>}, {transform_indices = @transform_4, window_bounds = array<i64: 1, 12, 12, 8>}, {transform_indices = @transform_5, window_bounds = array<i64: 1, 2, 8>}]} {
    %c0 = arith.constant 0 : index
    %c0_0 = arith.constant 0 : index
    %0 = vector.load %arg2[%c0, %c0_0] : memref<1x8xf32, #tpu.memory_space<vmem>>, vector<1x8xf32>
    %c0_1 = arith.constant 0 : index
    %c0_2 = arith.constant 0 : index
    %1 = vector.load %arg3[%c0_1, %c0_2] : memref<1x8xf32, #tpu.memory_space<vmem>>, vector<1x8xf32>
    %c0_i32 = arith.constant 0 : i32
    %c14_i32 = arith.constant 14 : i32
    %2 = arith.addi %c0_i32, %c14_i32 : i32
    %c1_i32 = arith.constant 1 : i32
    scf.for %arg8 = %c0_i32 to %2 step %c1_i32  : i32 {
      %c0_12 = arith.constant 0 : index
      %12 = arith.index_cast %arg8 : i32 to index
      %c0_13 = arith.constant 0 : index
      %c0_14 = arith.constant 0 : index
      %13 = vector.load %arg1[%c0_12, %12, %c0_13, %c0_14] : memref<1x14x14x8xf32, #tpu.memory_space<vmem>>, vector<1x1x14x8xf32>
      %14 = vector.shape_cast %13 : vector<1x1x14x8xf32> to vector<14x8xf32>
      %15 = vector.broadcast %0 : vector<1x8xf32> to vector<14x8xf32>
      %16 = arith.mulf %14, %15 : vector<14x8xf32>
      %17 = vector.broadcast %1 : vector<1x8xf32> to vector<14x8xf32>
      %18 = arith.addf %16, %17 : vector<14x8xf32>
      %cst_15 = arith.constant 0.000000e+00 : f32
      %19 = vector.broadcast %cst_15 : f32 to vector<14x8xf32>
      %20 = arith.maximumf %18, %19 : vector<14x8xf32>
      %21 = arith.index_cast %arg8 : i32 to index
      %c0_16 = arith.constant 0 : index
      %c0_17 = arith.constant 0 : index
      %22 = vector.load %arg7[%21, %c0_16, %c0_17] : memref<14x14x8xf32, #tpu.memory_space<vmem>>, vector<1x14x8xf32>
      %23 = vector.shape_cast %22 : vector<1x14x8xf32> to vector<14x8xf32>
      %24 = vector.shape_cast %20 : vector<14x8xf32> to vector<1x14x8xf32>
      tpu.vector_store %arg7[%21, %c0_16, %c0_17], %24 {strides = array<i32>} : memref<14x14x8xf32, #tpu.memory_space<vmem>>, vector<1x14x8xf32>,
    }
    %c14_i32_3 = arith.constant 14 : i32
    %cst = arith.constant 0.000000e+00 : f32
    %3 = vector.broadcast %cst : f32 to vector<1x8xf32>
    %c0_i32_4 = arith.constant 0 : i32
    %c12_i32 = arith.constant 12 : i32
    %4 = arith.addi %c0_i32_4, %c12_i32 : i32
    %c1_i32_5 = arith.constant 1 : i32
    %5:2 = scf.for %arg8 = %c0_i32_4 to %4 step %c1_i32_5 iter_args(%arg9 = %3, %arg10 = %3) -> (vector<1x8xf32>, vector<1x8xf32>)  : i32 {
      %cst_12 = arith.constant 0.000000e+00 : f32
      %12 = vector.broadcast %cst_12 : f32 to vector<12x8xf32>
      %c0_i32_13 = arith.constant 0 : i32
      %13 = arith.addi %arg8, %c0_i32_13 : i32
      %14 = arith.index_cast %13 : i32 to index
      %c0_14 = arith.constant 0 : index
      %c0_15 = arith.constant 0 : index
      %15 = vector.load %arg7[%14, %c0_14, %c0_15] : memref<14x14x8xf32, #tpu.memory_space<vmem>>, vector<1x12x8xf32>
      %16 = vector.shape_cast %15 : vector<1x12x8xf32> to vector<12x8xf32>
      %c0_16 = arith.constant 0 : index
      %c0_17 = arith.constant 0 : index
      %c0_18 = arith.constant 0 : index
      %c0_19 = arith.constant 0 : index
      %17 = vector.load %arg4[%c0_16, %c0_17, %c0_18, %c0_19] : memref<3x3x8x8xf32, #tpu.memory_space<vmem>>, vector<1x1x8x8xf32>
      %18 = vector.shape_cast %17 : vector<1x1x8x8xf32> to vector<8x8xf32>
      %cst_20 = arith.constant dense<0.000000e+00> : vector<12x8xf32>
      %19 = tpu.matmul %16, %18, %cst_20 {dimension_numbers = #tpu.dot_dimension_numbers<[1], [0], [0], [1], [0, 0, 1, 1], [], []>} : vector<12x8xf32>, vector<8x8xf32>, vector<12x8xf32> -> vector<12x8xf32>
      %20 = arith.addf %12, %19 : vector<12x8xf32>
      %c0_i32_21 = arith.constant 0 : i32
      %21 = arith.addi %arg8, %c0_i32_21 : i32
      %22 = arith.index_cast %21 : i32 to index
      %c1_22 = arith.constant 1 : index
      %c0_23 = arith.constant 0 : index
      %23 = vector.load %arg7[%22, %c1_22, %c0_23] : memref<14x14x8xf32, #tpu.memory_space<vmem>>, vector<1x12x8xf32>
      %24 = vector.shape_cast %23 : vector<1x12x8xf32> to vector<12x8xf32>
      %c0_24 = arith.constant 0 : index
      %c1_25 = arith.constant 1 : index
      %c0_26 = arith.constant 0 : index
      %c0_27 = arith.constant 0 : index
      %25 = vector.load %arg4[%c0_24, %c1_25, %c0_26, %c0_27] : memref<3x3x8x8xf32, #tpu.memory_space<vmem>>, vector<1x1x8x8xf32>
      %26 = vector.shape_cast %25 : vector<1x1x8x8xf32> to vector<8x8xf32>
      %cst_28 = arith.constant dense<0.000000e+00> : vector<12x8xf32>
      %27 = tpu.matmul %24, %26, %cst_28 {dimension_numbers = #tpu.dot_dimension_numbers<[1], [0], [0], [1], [0, 0, 1, 1], [], []>} : vector<12x8xf32>, vector<8x8xf32>, vector<12x8xf32> -> vector<12x8xf32>
      %28 = arith.addf %20, %27 : vector<12x8xf32>
      %c0_i32_29 = arith.constant 0 : i32
      %29 = arith.addi %arg8, %c0_i32_29 : i32
      %30 = arith.index_cast %29 : i32 to index
      %c2 = arith.constant 2 : index
      %c0_30 = arith.constant 0 : index
      %31 = vector.load %arg7[%30, %c2, %c0_30] : memref<14x14x8xf32, #tpu.memory_space<vmem>>, vector<1x12x8xf32>
      %32 = vector.shape_cast %31 : vector<1x12x8xf32> to vector<12x8xf32>
      %c0_31 = arith.constant 0 : index
      %c2_32 = arith.constant 2 : index
      %c0_33 = arith.constant 0 : index
      %c0_34 = arith.constant 0 : index
      %33 = vector.load %arg4[%c0_31, %c2_32, %c0_33, %c0_34] : memref<3x3x8x8xf32, #tpu.memory_space<vmem>>, vector<1x1x8x8xf32>
      %34 = vector.shape_cast %33 : vector<1x1x8x8xf32> to vector<8x8xf32>
      %cst_35 = arith.constant dense<0.000000e+00> : vector<12x8xf32>
      %35 = tpu.matmul %32, %34, %cst_35 {dimension_numbers = #tpu.dot_dimension_numbers<[1], [0], [0], [1], [0, 0, 1, 1], [], []>} : vector<12x8xf32>, vector<8x8xf32>, vector<12x8xf32> -> vector<12x8xf32>
      %36 = arith.addf %28, %35 : vector<12x8xf32>
      %c1_i32_36 = arith.constant 1 : i32
      %37 = arith.addi %arg8, %c1_i32_36 : i32
      %38 = arith.index_cast %37 : i32 to index
      %c0_37 = arith.constant 0 : index
      %c0_38 = arith.constant 0 : index
      %39 = vector.load %arg7[%38, %c0_37, %c0_38] : memref<14x14x8xf32, #tpu.memory_space<vmem>>, vector<1x12x8xf32>
      %40 = vector.shape_cast %39 : vector<1x12x8xf32> to vector<12x8xf32>
      %c1_39 = arith.constant 1 : index
      %c0_40 = arith.constant 0 : index
      %c0_41 = arith.constant 0 : index
      %c0_42 = arith.constant 0 : index
      %41 = vector.load %arg4[%c1_39, %c0_40, %c0_41, %c0_42] : memref<3x3x8x8xf32, #tpu.memory_space<vmem>>, vector<1x1x8x8xf32>
      %42 = vector.shape_cast %41 : vector<1x1x8x8xf32> to vector<8x8xf32>
      %cst_43 = arith.constant dense<0.000000e+00> : vector<12x8xf32>
      %43 = tpu.matmul %40, %42, %cst_43 {dimension_numbers = #tpu.dot_dimension_numbers<[1], [0], [0], [1], [0, 0, 1, 1], [], []>} : vector<12x8xf32>, vector<8x8xf32>, vector<12x8xf32> -> vector<12x8xf32>
      %44 = arith.addf %36, %43 : vector<12x8xf32>
      %c1_i32_44 = arith.constant 1 : i32
      %45 = arith.addi %arg8, %c1_i32_44 : i32
      %46 = arith.index_cast %45 : i32 to index
      %c1_45 = arith.constant 1 : index
      %c0_46 = arith.constant 0 : index
      %47 = vector.load %arg7[%46, %c1_45, %c0_46] : memref<14x14x8xf32, #tpu.memory_space<vmem>>, vector<1x12x8xf32>
      %48 = vector.shape_cast %47 : vector<1x12x8xf32> to vector<12x8xf32>
      %c1_47 = arith.constant 1 : index
      %c1_48 = arith.constant 1 : index
      %c0_49 = arith.constant 0 : index
      %c0_50 = arith.constant 0 : index
      %49 = vector.load %arg4[%c1_47, %c1_48, %c0_49, %c0_50] : memref<3x3x8x8xf32, #tpu.memory_space<vmem>>, vector<1x1x8x8xf32>
      %50 = vector.shape_cast %49 : vector<1x1x8x8xf32> to vector<8x8xf32>
      %cst_51 = arith.constant dense<0.000000e+00> : vector<12x8xf32>
      %51 = tpu.matmul %48, %50, %cst_51 {dimension_numbers = #tpu.dot_dimension_numbers<[1], [0], [0], [1], [0, 0, 1, 1], [], []>} : vector<12x8xf32>, vector<8x8xf32>, vector<12x8xf32> -> vector<12x8xf32>
      %52 = arith.addf %44, %51 : vector<12x8xf32>
      %c1_i32_52 = arith.constant 1 : i32
      %53 = arith.addi %arg8, %c1_i32_52 : i32
      %54 = arith.index_cast %53 : i32 to index
      %c2_53 = arith.constant 2 : index
      %c0_54 = arith.constant 0 : index
      %55 = vector.load %arg7[%54, %c2_53, %c0_54] : memref<14x14x8xf32, #tpu.memory_space<vmem>>, vector<1x12x8xf32>
      %56 = vector.shape_cast %55 : vector<1x12x8xf32> to vector<12x8xf32>
      %c1_55 = arith.constant 1 : index
      %c2_56 = arith.constant 2 : index
      %c0_57 = arith.constant 0 : index
      %c0_58 = arith.constant 0 : index
      %57 = vector.load %arg4[%c1_55, %c2_56, %c0_57, %c0_58] : memref<3x3x8x8xf32, #tpu.memory_space<vmem>>, vector<1x1x8x8xf32>
      %58 = vector.shape_cast %57 : vector<1x1x8x8xf32> to vector<8x8xf32>
      %cst_59 = arith.constant dense<0.000000e+00> : vector<12x8xf32>
      %59 = tpu.matmul %56, %58, %cst_59 {dimension_numbers = #tpu.dot_dimension_numbers<[1], [0], [0], [1], [0, 0, 1, 1], [], []>} : vector<12x8xf32>, vector<8x8xf32>, vector<12x8xf32> -> vector<12x8xf32>
      %60 = arith.addf %52, %59 : vector<12x8xf32>
      %c2_i32 = arith.constant 2 : i32
      %61 = arith.addi %arg8, %c2_i32 : i32
      %62 = arith.index_cast %61 : i32 to index
      %c0_60 = arith.constant 0 : index
      %c0_61 = arith.constant 0 : index
      %63 = vector.load %arg7[%62, %c0_60, %c0_61] : memref<14x14x8xf32, #tpu.memory_space<vmem>>, vector<1x12x8xf32>
      %64 = vector.shape_cast %63 : vector<1x12x8xf32> to vector<12x8xf32>
      %c2_62 = arith.constant 2 : index
      %c0_63 = arith.constant 0 : index
      %c0_64 = arith.constant 0 : index
      %c0_65 = arith.constant 0 : index
      %65 = vector.load %arg4[%c2_62, %c0_63, %c0_64, %c0_65] : memref<3x3x8x8xf32, #tpu.memory_space<vmem>>, vector<1x1x8x8xf32>
      %66 = vector.shape_cast %65 : vector<1x1x8x8xf32> to vector<8x8xf32>
      %cst_66 = arith.constant dense<0.000000e+00> : vector<12x8xf32>
      %67 = tpu.matmul %64, %66, %cst_66 {dimension_numbers = #tpu.dot_dimension_numbers<[1], [0], [0], [1], [0, 0, 1, 1], [], []>} : vector<12x8xf32>, vector<8x8xf32>, vector<12x8xf32> -> vector<12x8xf32>
      %68 = arith.addf %60, %67 : vector<12x8xf32>
      %c2_i32_67 = arith.constant 2 : i32
      %69 = arith.addi %arg8, %c2_i32_67 : i32
      %70 = arith.index_cast %69 : i32 to index
      %c1_68 = arith.constant 1 : index
      %c0_69 = arith.constant 0 : index
      %71 = vector.load %arg7[%70, %c1_68, %c0_69] : memref<14x14x8xf32, #tpu.memory_space<vmem>>, vector<1x12x8xf32>
      %72 = vector.shape_cast %71 : vector<1x12x8xf32> to vector<12x8xf32>
      %c2_70 = arith.constant 2 : index
      %c1_71 = arith.constant 1 : index
      %c0_72 = arith.constant 0 : index
      %c0_73 = arith.constant 0 : index
      %73 = vector.load %arg4[%c2_70, %c1_71, %c0_72, %c0_73] : memref<3x3x8x8xf32, #tpu.memory_space<vmem>>, vector<1x1x8x8xf32>
      %74 = vector.shape_cast %73 : vector<1x1x8x8xf32> to vector<8x8xf32>
      %cst_74 = arith.constant dense<0.000000e+00> : vector<12x8xf32>
      %75 = tpu.matmul %72, %74, %cst_74 {dimension_numbers = #tpu.dot_dimension_numbers<[1], [0], [0], [1], [0, 0, 1, 1], [], []>} : vector<12x8xf32>, vector<8x8xf32>, vector<12x8xf32> -> vector<12x8xf32>
      %76 = arith.addf %68, %75 : vector<12x8xf32>
      %c2_i32_75 = arith.constant 2 : i32
      %77 = arith.addi %arg8, %c2_i32_75 : i32
      %78 = arith.index_cast %77 : i32 to index
      %c2_76 = arith.constant 2 : index
      %c0_77 = arith.constant 0 : index
      %79 = vector.load %arg7[%78, %c2_76, %c0_77] : memref<14x14x8xf32, #tpu.memory_space<vmem>>, vector<1x12x8xf32>
      %80 = vector.shape_cast %79 : vector<1x12x8xf32> to vector<12x8xf32>
      %c2_78 = arith.constant 2 : index
      %c2_79 = arith.constant 2 : index
      %c0_80 = arith.constant 0 : index
      %c0_81 = arith.constant 0 : index
      %81 = vector.load %arg4[%c2_78, %c2_79, %c0_80, %c0_81] : memref<3x3x8x8xf32, #tpu.memory_space<vmem>>, vector<1x1x8x8xf32>
      %82 = vector.shape_cast %81 : vector<1x1x8x8xf32> to vector<8x8xf32>
      %cst_82 = arith.constant dense<0.000000e+00> : vector<12x8xf32>
      %83 = tpu.matmul %80, %82, %cst_82 {dimension_numbers = #tpu.dot_dimension_numbers<[1], [0], [0], [1], [0, 0, 1, 1], [], []>} : vector<12x8xf32>, vector<8x8xf32>, vector<12x8xf32> -> vector<12x8xf32>
      %84 = arith.addf %76, %83 : vector<12x8xf32>
      %c0_83 = arith.constant 0 : index
      %85 = arith.index_cast %arg8 : i32 to index
      %c0_84 = arith.constant 0 : index
      %c0_85 = arith.constant 0 : index
      %86 = vector.load %arg5[%c0_83, %85, %c0_84, %c0_85] : memref<1x12x12x8xf32, #tpu.memory_space<vmem>>, vector<1x1x12x8xf32>
      %87 = vector.shape_cast %86 : vector<1x1x12x8xf32> to vector<12x8xf32>
      %88 = vector.shape_cast %84 : vector<12x8xf32> to vector<1x1x12x8xf32>
      tpu.vector_store %arg5[%c0_83, %85, %c0_84, %c0_85], %88 {strides = array<i32>} : memref<1x12x12x8xf32, #tpu.memory_space<vmem>>, vector<1x1x12x8xf32>,
      %cst_86 = arith.constant dense<0.000000e+00> : vector<8xf32>
      %89 = vector.multi_reduction <add>, %84, %cst_86 [0] : vector<12x8xf32> to vector<8xf32>
      %90 = vector.shape_cast %89 : vector<8xf32> to vector<1x8xf32>
      %91 = arith.addf %arg9, %90 : vector<1x8xf32>
      %92 = arith.mulf %84, %84 : vector<12x8xf32>
      %cst_87 = arith.constant dense<0.000000e+00> : vector<8xf32>
      %93 = vector.multi_reduction <add>, %92, %cst_87 [0] : vector<12x8xf32> to vector<8xf32>
      %94 = vector.shape_cast %93 : vector<8xf32> to vector<1x8xf32>
      %95 = arith.addf %arg10, %94 : vector<1x8xf32>
      scf.yield %91, %95 : vector<1x8xf32>, vector<1x8xf32>
    }
    %c12_i32_6 = arith.constant 12 : i32
    %c0_7 = arith.constant 0 : index
    %c0_8 = arith.constant 0 : index
    %c0_9 = arith.constant 0 : index
    %6 = vector.load %arg6[%c0_7, %c0_8, %c0_9] : memref<1x2x8xf32, #tpu.memory_space<vmem>>, vector<1x1x8xf32>
    %7 = vector.shape_cast %6 : vector<1x1x8xf32> to vector<1x8xf32>
    %8 = vector.shape_cast %5#0 : vector<1x8xf32> to vector<1x1x8xf32>
    tpu.vector_store %arg6[%c0_7, %c0_8, %c0_9], %8 {strides = array<i32>} : memref<1x2x8xf32, #tpu.memory_space<vmem>>, vector<1x1x8xf32>,
    %c0_10 = arith.constant 0 : index
    %c1 = arith.constant 1 : index
    %c0_11 = arith.constant 0 : index
    %9 = vector.load %arg6[%c0_10, %c1, %c0_11] : memref<1x2x8xf32, #tpu.memory_space<vmem>>, vector<1x1x8xf32>
    %10 = vector.shape_cast %9 : vector<1x1x8xf32> to vector<1x8xf32>
    %11 = vector.shape_cast %5#1 : vector<1x8xf32> to vector<1x1x8xf32>
    tpu.vector_store %arg6[%c0_10, %c1, %c0_11], %11 {strides = array<i32>} : memref<1x2x8xf32, #tpu.memory_space<vmem>>, vector<1x1x8xf32>,
    return
  }
  func.func @transform_0(%arg0: i32) -> (i32, i32, i32, i32) {
    %c0_i32 = arith.constant 0 : i32
    %c0_i32_0 = arith.constant 0 : i32
    %c0_i32_1 = arith.constant 0 : i32
    %c0_i32_2 = arith.constant 0 : i32
    return %arg0, %c0_i32, %c0_i32_0, %c0_i32_1 : i32, i32, i32, i32
  }
  func.func @transform_1(%arg0: i32) -> (i32, i32) {
    %c0_i32 = arith.constant 0 : i32
    %c0_i32_0 = arith.constant 0 : i32
    %c0_i32_1 = arith.constant 0 : i32
    return %c0_i32, %c0_i32_0 : i32, i32
  }
  func.func @transform_2(%arg0: i32) -> (i32, i32) {
    %c0_i32 = arith.constant 0 : i32
    %c0_i32_0 = arith.constant 0 : i32
    %c0_i32_1 = arith.constant 0 : i32
    return %c0_i32, %c0_i32_0 : i32, i32
  }
  func.func @transform_3(%arg0: i32) -> (i32, i32, i32, i32) {
    %c0_i32 = arith.constant 0 : i32
    %c0_i32_0 = arith.constant 0 : i32
    %c0_i32_1 = arith.constant 0 : i32
    %c0_i32_2 = arith.constant 0 : i32
    %c0_i32_3 = arith.constant 0 : i32
    return %c0_i32, %c0_i32_0, %c0_i32_1, %c0_i32_2 : i32, i32, i32, i32
  }
  func.func @transform_4(%arg0: i32) -> (i32, i32, i32, i32) {
    %c0_i32 = arith.constant 0 : i32
    %c0_i32_0 = arith.constant 0 : i32
    %c0_i32_1 = arith.constant 0 : i32
    %c0_i32_2 = arith.constant 0 : i32
    return %arg0, %c0_i32, %c0_i32_0, %c0_i32_1 : i32, i32, i32, i32
  }
  func.func @transform_5(%arg0: i32) -> (i32, i32, i32) {
    %c0_i32 = arith.constant 0 : i32
    %c0_i32_0 = arith.constant 0 : i32
    %c0_i32_1 = arith.constant 0 : i32
    return %arg0, %c0_i32, %c0_i32_0 : i32, i32, i32
  }
}

module attributes {stable_mosaic.version = 11 : i64} {
  func.func @_bnrelu_kernel(%arg0: i32, %arg1: memref<1x12x12x8xf32, #tpu.memory_space<vmem>>, %arg2: memref<1x8xf32, #tpu.memory_space<vmem>>, %arg3: memref<1x8xf32, #tpu.memory_space<vmem>>, %arg4: memref<1x12x12x8xf32, #tpu.memory_space<vmem>>) attributes {dimension_semantics = [#tpu.dimension_semantics<parallel>], iteration_bounds = array<i64: 2>, scalar_prefetch = 0 : i64, scratch_operands = 0 : i64, tpu.core_type = #tpu.core_type<tc>, window_params = [{transform_indices = @transform_0, window_bounds = array<i64: 1, 12, 12, 8>}, {pipeline_mode = #tpu.pipeline_mode<synchronous>, transform_indices = @transform_1, window_bounds = array<i64: 1, 8>}, {pipeline_mode = #tpu.pipeline_mode<synchronous>, transform_indices = @transform_2, window_bounds = array<i64: 1, 8>}, {transform_indices = @transform_3, window_bounds = array<i64: 1, 12, 12, 8>}]} {
    %c0 = arith.constant 0 : index
    %c0_0 = arith.constant 0 : index
    %0 = vector.load %arg2[%c0, %c0_0] : memref<1x8xf32, #tpu.memory_space<vmem>>, vector<1x8xf32>
    %c0_1 = arith.constant 0 : index
    %c0_2 = arith.constant 0 : index
    %1 = vector.load %arg3[%c0_1, %c0_2] : memref<1x8xf32, #tpu.memory_space<vmem>>, vector<1x8xf32>
    %c0_i32 = arith.constant 0 : i32
    %c12_i32 = arith.constant 12 : i32
    %2 = arith.addi %c0_i32, %c12_i32 : i32
    %c1_i32 = arith.constant 1 : i32
    scf.for %arg5 = %c0_i32 to %2 step %c1_i32  : i32 {
      %c0_4 = arith.constant 0 : index
      %3 = arith.index_cast %arg5 : i32 to index
      %c0_5 = arith.constant 0 : index
      %c0_6 = arith.constant 0 : index
      %4 = vector.load %arg1[%c0_4, %3, %c0_5, %c0_6] : memref<1x12x12x8xf32, #tpu.memory_space<vmem>>, vector<1x1x12x8xf32>
      %5 = vector.shape_cast %4 : vector<1x1x12x8xf32> to vector<12x8xf32>
      %6 = vector.broadcast %0 : vector<1x8xf32> to vector<12x8xf32>
      %7 = arith.mulf %5, %6 : vector<12x8xf32>
      %8 = vector.broadcast %1 : vector<1x8xf32> to vector<12x8xf32>
      %9 = arith.addf %7, %8 : vector<12x8xf32>
      %cst = arith.constant 0.000000e+00 : f32
      %10 = vector.broadcast %cst : f32 to vector<12x8xf32>
      %11 = arith.maximumf %9, %10 : vector<12x8xf32>
      %c0_7 = arith.constant 0 : index
      %12 = arith.index_cast %arg5 : i32 to index
      %c0_8 = arith.constant 0 : index
      %c0_9 = arith.constant 0 : index
      %13 = vector.load %arg4[%c0_7, %12, %c0_8, %c0_9] : memref<1x12x12x8xf32, #tpu.memory_space<vmem>>, vector<1x1x12x8xf32>
      %14 = vector.shape_cast %13 : vector<1x1x12x8xf32> to vector<12x8xf32>
      %15 = vector.shape_cast %11 : vector<12x8xf32> to vector<1x1x12x8xf32>
      tpu.vector_store %arg4[%c0_7, %12, %c0_8, %c0_9], %15 {strides = array<i32>} : memref<1x12x12x8xf32, #tpu.memory_space<vmem>>, vector<1x1x12x8xf32>,
    }
    %c12_i32_3 = arith.constant 12 : i32
    return
  }
  func.func @transform_0(%arg0: i32) -> (i32, i32, i32, i32) {
    %c0_i32 = arith.constant 0 : i32
    %c0_i32_0 = arith.constant 0 : i32
    %c0_i32_1 = arith.constant 0 : i32
    %c0_i32_2 = arith.constant 0 : i32
    return %arg0, %c0_i32, %c0_i32_0, %c0_i32_1 : i32, i32, i32, i32
  }
  func.func @transform_1(%arg0: i32) -> (i32, i32) {
    %c0_i32 = arith.constant 0 : i32
    %c0_i32_0 = arith.constant 0 : i32
    %c0_i32_1 = arith.constant 0 : i32
    return %c0_i32, %c0_i32_0 : i32, i32
  }
  func.func @transform_2(%arg0: i32) -> (i32, i32) {
    %c0_i32 = arith.constant 0 : i32
    %c0_i32_0 = arith.constant 0 : i32
    %c0_i32_1 = arith.constant 0 : i32
    return %c0_i32, %c0_i32_0 : i32, i32
  }
  func.func @transform_3(%arg0: i32) -> (i32, i32, i32, i32) {
    %c0_i32 = arith.constant 0 : i32
    %c0_i32_0 = arith.constant 0 : i32
    %c0_i32_1 = arith.constant 0 : i32
    %c0_i32_2 = arith.constant 0 : i32
    return %arg0, %c0_i32, %c0_i32_0, %c0_i32_1 : i32, i32, i32, i32
  }
}

</mosaic_0001>

<bundles_post_ra>
// kernel: double_conv_orig_forward.5
= control target key start
LH: loop header
LB: loop body
LE: loop exit
PB: predicated region body
PF: predicated region fallthrough
CT: control target
= control target key end

     0   :  { %s335_s12 = smov 0   ;;  %s358_s0 = inlined_call_operand.vmem [shape: f32[2,12,12,8], index: 0, kind: input, shape index: {}]   ;;  %s359_s1 = inlined_call_operand.vmem [shape: f32[1,8], index: 1, kind: input, shape index: {}]   ;;  %s360_s2 = inlined_call_operand.vmem [shape: f32[1,8], index: 2, kind: input, shape index: {}]   ;;  %s361_s3 = inlined_call_operand.vmem [shape: f32[2,12,12,8], index: 3, kind: output, shape index: {}]  }
   0x1 LB: > { %s270_s13 = sadd.s32 4294967295, %s309_s12   ;;  %p274_p0 = scmp.ge.s32.totalorder %s309_s12, 1  ;;  %s309_s12 = sphi %s335_s12, %s13_s12  }
   0x2   : > { %p137_p1 = scmp.lt.s32.totalorder %s309_s12, 3 }
   0x4   : > { %p138_p2 = pnand %p274_p0, %p137_p1 }
   0x5   : > { %p161_p3 = scmp.lt.s32.totalorder (!%p138_p2), %s270_s13, 1  ;;  %v278_v0 = vld [vmem:[%s359_s1] ss:$0 sm:$0xff] (!%p138_p2)  ;;  %s311_s25 = smov (!%p138_p2), 0  }
   0x6   : > { %141 = sbr.rel (%p138_p2) target bundleno = 28 (0x1c), region = 32  ;;  %v279_v1 = vld [vmem:[%s360_s2] ss:$0 sm:$0xff] (!%p138_p2) }
   0xd   : > { %s363_s13 = smov (!%p161_p3, %s270_s13), 1 }
   0xe   : > { %s282_s18 = smul.u32 192, %s363_s13 }
  0x10   : > { %s165_s21 = scalar_lea.vmem %s358_s0, %s282_s18  ;;  %s170_s24 = scalar_lea.vmem %s361_s3, %s282_s18 }
  0x11 LB: >> { %s277_s26 = sshll.u32 %s313_s25, 4  ;;  %vm202_vm0 = vcmask 64512   ;;  %vm204_vm1 = vcmask 60416   ;;  %s178_s25 = sadd.s32 1, %s313_s25   ;;  %s313_s25 = sphi %s311_s25, %s178_s25  }
  0x12   : >> { %s180_s27 = scalar_lea.vmem %s165_s21, %s277_s26  ;;  %s201_s28 = scalar_lea.vmem %s170_s24, %s277_s26 }
  0x13   : >> { %v181_v2 = vld [vmem:[%s180_s27] sm:$0xff]  ;;  %v182_v3 = vld [vmem:[%s180_s27 + $0x8] sm:$0xf]  ;;  %p175_p4 = scmp.ge.s32.totalorder %s178_s25, 12  }
  0x14   : >> { %v189_v4 = vmul.f32 %v278_v0, %v181_v2  ;;  %v190_v5 = vmul.f32 %v278_v0, %v182_v3 }
  0x15   : > { %177 = sbr.rel (!%p175_p4) target bundleno = 17 (0x11), region = 71 }
  0x16   : >> { %v197_v6 = vadd.f32 %v279_v1, %v189_v4  ;;  %v198_v7 = vadd.f32 %v279_v1, %v190_v5 }
  0x18   : >> { %v199_v8 = vmax.f32 %v197_v6, 0.0  ;;  %v200_v9 = vmax.f32 %v198_v7, 0.0 }
  0x1a   : >> { %203 = vst.msk [vmem:[%s201_s28] sm:$0xff] %vm202_vm0, %v199_v8 }
  0x1b   : >> { %205 = vst.msk [vmem:[%s201_s28 + $0x8] sm:$0xf] %vm204_vm1, %v200_v9 }
  0x1c PF: > { %s13_s12 = sadd.s32 1, %s309_s12  }
  0x1d   : > { %p10_p5 = scmp.ge.s32.totalorder %s13_s12, 4  }
  0x1f   :  { %12 = sbr.rel (!%p10_p5) target bundleno = 1 (0x1), region = 82 }

// kernel: double_conv_orig_forward.3
= control target key start
LH: loop header
LB: loop body
LE: loop exit
PB: predicated region body
PF: predicated region fallthrough
CT: control target
= control target key end

     0   :  { %s1377_s12 = smov 0   ;;  %s1519_s0 = inlined_call_operand.vmem [shape: f32[2,16,16,4], index: 0, kind: input, shape index: {}]   ;;  %s1520_s1 = inlined_call_operand.vmem [shape: f32[3,3,4,8], index: 1, kind: input, shape index: {}]   ;;  %s1521_s2 = inlined_call_operand.vmem [shape: f32[2,14,14,8], index: 2, kind: output, shape index: {0}]   ;;  %s1522_s3 = inlined_call_operand.vmem [shape: f32[2,2,8], index: 3, kind: output, shape index: {1}]  }
   0x1 LB: > { %s1142_s13 = sadd.s32 4294967295, %s1343_s12   ;;  %p1146_p0 = scmp.ge.s32.totalorder %s1343_s12, 1  ;;  %s1343_s12 = sphi %s1377_s12, %s14_s12  }
   0x2   : > { %p140_p1 = scmp.lt.s32.totalorder %s1343_s12, 3 }
   0x4   : > { %p141_p2 = pnand %p1146_p0, %p140_p1 }
   0x5   : > { %p168_p3 = scmp.lt.s32.totalorder (!%p141_p2), %s1142_s13, 1  ;;  %v1400_v0 = vmov (!%p141_p2), 0.0   ;;  %v1402_v1 = vmov (!%p141_p2), 0.0   ;;  %s1404_s26 = smov (!%p141_p2), 0  }
   0x6   : > { %144 = sbr.rel (%p141_p2) target bundleno = 289 (0x121), region = 28 }
   0xd   : > { %s1526_s13 = smov (!%p168_p3, %s1142_s13), 1 }
   0xe   : > { %s1203_s14 = sshll.u32 %s1526_s13, 8  ;;  %s1292_s15 = smul.u32 224, %s1526_s13 }
   0xf   : > { %s1388_s18 = scalar_lea.vmem %s1519_s0, %s1203_s14  ;;  %s1150_s19 = sshll.u32 %s1526_s13, 1 }
  0x10   : > { %s1393_s22 = scalar_lea.vmem %s1521_s2, %s1292_s15  ;;  %s1398_s25 = scalar_lea.vmem %s1522_s3, %s1150_s19 }
  0x11 LB: >> { %vm206_vm0 = vcmask 1043456   ;;  %v1172_v2 = vld [vmem:[%s1520_s1 + $0x10] sm:$0xf]  ;;  %v1152_v3 = vld [vmem:[%s1520_s1 + $0x4] sm:$0xf]  ;;  %s1151_s8 = sshll.u32 %s1355_s26, 4  ;;  %s1355_s26 = sphi %s1404_s26, %s187_s26   ;;  %v1351_v1 = vphi %v1402_v1, %v1524_v1   ;;  %v1347_v0 = vphi %v1400_v0, %v1523_v0  }
  0x12   : >> { %1251 = vmatprep.subr.msk.mxu0 %vm206_vm0, %v1172_v2  ;;  %1231 = vmatprep.subr.msk.mxu1 %vm206_vm0, %v1152_v3  ;;  %v1178_v4 = vld [vmem:[%s1520_s1 + $0x14] sm:$0xf]  ;;  %v194_v5 = vld [vmem:[%s1520_s1] sm:$0xf]  ;;  %vm199_vm1 = vcmask 31744   ;;  %s1435_s9 = scalar_lea.vmem %s1388_s18, %s1151_s8  ;;  %s1005_s23 = scalar_lea.vmem %s1393_s22, %s1151_s8  ;;  %vm1008_vm2 = vcmask 62464  }
  0x13   : >> { %1252 = vmatpush3.msk.msra.mxu0 %vm206_vm0, %v1172_v2  ;;  %1232 = vmatpush3.msk.msra.mxu1 %vm206_vm0, %v1152_v3  ;;  %v195_v6 = vld [vmem:[%s1435_s9 + $0x1] sm:$0xff]  ;;  %v1170_v7 = vld [vmem:[%s1435_s9 + $0x11] sm:$0xff]  ;;  %v196_v8 = vld [vmem:[%s1435_s9 + $0x9] sm:$0x3f]  ;;  %vm1006_vm3 = vcmask 64512   ;;  %s187_s26 = sadd.s32 1, %s1355_s26  }
  0x14   : >> { %1256 = vmatprep.subr.msk.mxu0 %vm206_vm0, %v1178_v4  ;;  %1236 = vmatprep.subr.msk.mxu1 %vm206_vm0, %v194_v5  ;;  %v1171_v9 = vld [vmem:[%s1435_s9 + $0x19] sm:$0x3f]  ;;  %v192_v10 = vld [vmem:[%s1435_s9] sm:$0xff]  ;;  %v1159_v13 = vld [vmem:[%s1520_s1 + $0x8] sm:$0xf]  ;;  %p184_p4 = scmp.ge.s32.totalorder %s187_s26, 14  }
  0x15   : >> { %1233 = vmatprep.mubr.msk.f32.mxu1 %vm199_vm1, %v195_v6  ;;  %1253 = vmatprep.mubr.msk.f32.mxu0 %vm199_vm1, %v1170_v7  ;;  %v1176_v11 = vld [vmem:[%s1435_s9 + $0x12] sm:$0xff]  ;;  %v193_v14 = vld [vmem:[%s1435_s9 + $0x8] sm:$0x3f]  ;;  %v1177_v15 = vld [vmem:[%s1435_s9 + $0x1a] sm:$0x3f]  ;;  %vm1032_vm4 = vcmask (%p184_p4), 57344  }
  0x16   : >> { %1234 = vmatmul.mubr.msk.f32.vlgmr.msra.gmra.mrb[0].mxu1 %vm199_vm1, %v196_v8  ;;  %1254 = vmatmul.mubr.msk.f32.vlgmr.msra.gmra.mrb[0].mxu0 %vm199_vm1, %v1171_v9  ;;  %v1185_v12 = vld [vmem:[%s1520_s1 + $0x18] sm:$0xf]  ;;  %v369_v16 = vld [vmem:[%s1435_s9 + $0x2] sm:$0xff]  ;;  %v1191_v18 = vld [vmem:[%s1520_s1 + $0x1c] sm:$0xf] }
  0x17   : >> { %1257 = vmatpush3.msk.msra.mxu0 %vm206_vm0, %v1178_v4  ;;  %1237 = vmatpush3.msk.msra.mxu1 %vm206_vm0, %v194_v5  ;;  %v1183_v17 = vld [vmem:[%s1435_s9 + $0x20] sm:$0xff]  ;;  %v1166_v19 = vld [vmem:[%s1520_s1 + $0xc] sm:$0xf]  ;;  %v1164_v22 = vld [vmem:[%s1435_s9 + $0x10] sm:$0xff] }
  0x18   : >> { %1238 = vmatprep.mubr.msk.f32.mxu1 %vm199_vm1, %v192_v10  ;;  %1258 = vmatprep.mubr.msk.f32.mxu0 %vm199_vm1, %v1176_v11  ;;  %v370_v20 = vld [vmem:[%s1435_s9 + $0xa] sm:$0x3f]  ;;  %v1189_v23 = vld [vmem:[%s1435_s9 + $0x21] sm:$0xff]  ;;  %v1165_v25 = vld [vmem:[%s1435_s9 + $0x18] sm:$0x3f] }
  0x19   : >> { %1261 = vmatprep.subr.msk.mxu0 %vm206_vm0, %v1185_v12  ;;  %1241 = vmatprep.subr.msk.mxu1 %vm206_vm0, %v1159_v13  ;;  %v1184_v21 = vld [vmem:[%s1435_s9 + $0x28] sm:$0x3f]  ;;  %v1197_v24 = vld [vmem:[%s1520_s1 + $0x20] sm:$0xf] }
  0x1a   : >> { %v1190_v26 = vld [vmem:[%s1435_s9 + $0x29] sm:$0x3f] }
  0x1b   : >> { %v1195_v27 = vld [vmem:[%s1435_s9 + $0x22] sm:$0xff]  ;;  %v1196_v28 = vld [vmem:[%s1435_s9 + $0x2a] sm:$0x3f] }
  0x1e   : >> { %1239 = vmatmul.mubr.msk.f32.vlgmr.msra.gmra.mrb[0].mxu1 %vm199_vm1, %v193_v14  ;;  %1259 = vmatmul.mubr.msk.f32.vlgmr.msra.gmra.mrb[0].mxu0 %vm199_vm1, %v1177_v15 }
  0x1f   : >> { %1262 = vmatpush3.msk.msra.mxu0 %vm206_vm0, %v1185_v12  ;;  %1242 = vmatpush3.msk.msra.mxu1 %vm206_vm0, %v1159_v13 }
  0x20   : >> { %1243 = vmatprep.mubr.msk.f32.mxu1 %vm199_vm1, %v369_v16  ;;  %1263 = vmatprep.mubr.msk.f32.mxu0 %vm199_vm1, %v1183_v17 }
  0x21   : >> { %1266 = vmatprep.subr.msk.mxu0 %vm206_vm0, %v1191_v18  ;;  %1246 = vmatprep.subr.msk.mxu1 %vm206_vm0, %v1166_v19 }
  0x26   : >> { %1244 = vmatmul.mubr.msk.f32.vlgmr.msra.gmra.mrb[0].mxu1 %vm199_vm1, %v370_v20  ;;  %1264 = vmatmul.mubr.msk.f32.vlgmr.msra.gmra.mrb[0].mxu0 %vm199_vm1, %v1184_v21 }
  0x27   : >> { %1267 = vmatpush3.msk.msra.mxu0 %vm206_vm0, %v1191_v18  ;;  %1247 = vmatpush3.msk.msra.mxu1 %vm206_vm0, %v1166_v19 }
  0x28   : >> { %1248 = vmatprep.mubr.msk.f32.mxu1 %vm199_vm1, %v1164_v22  ;;  %1268 = vmatprep.mubr.msk.f32.mxu0 %vm199_vm1, %v1189_v23 }
  0x29   : >> { %1271 = vmatprep.subr.msk.mxu0 %vm206_vm0, %v1197_v24 }
  0x2e   : >> { %1249 = vmatmul.mubr.msk.f32.vlgmr.msra.gmra.mrb[0].mxu1 %vm199_vm1, %v1165_v25  ;;  %1269 = vmatmul.mubr.msk.f32.vlgmr.msra.gmra.mrb[0].mxu0 %vm199_vm1, %v1190_v26 }
  0x2f   : >> { %1272 = vmatpush3.msk.msra.mxu0 %vm206_vm0, %v1197_v24  ;;  %1273 = vmatprep.mubr.msk.f32.mxu0 %vm199_vm1, %v1195_v27 }
  0x36   : >> { %1274 = vmatmul.mubr.msk.f32.vlgmr.msra.gmra.mrb[0].mxu0 %vm199_vm1, %v1196_v28 }
 0x101   : >> { %v1250_v29 = vpop.f32.mrb[0].mxu1 }
 0x102   : >> { %v541_v30 = vpop.f32.mrb[1].mxu1 }
 0x109   : >> { %v1275_v31 = vpop.f32.mrb[0].mxu0 }
 0x10a   : >> { %v1276_v32 = vadd.f32 %v1275_v31, %v1250_v29  ;;  %v994_v33 = vpop.f32.mrb[1].mxu0 }
 0x10b   : >> { %v1277_v34 = vadd.f32 %v994_v33, %v541_v30 }
 0x10c   : >> { %1009 = vst.msk [vmem:[%s1005_s23 + $0x8] sm:$0x3f] %vm1008_vm2, %v1276_v32  ;;  %v1011_v35 = vsel %vm1008_vm2, %v1276_v32, 0.0  ;;  %v1021_v36 = vmul.f32 %v1276_v32, %v1276_v32 }
 0x10d   : >> { %1007 = vst.msk [vmem:[%s1005_s23] sm:$0xff] %vm1006_vm3, %v1277_v34  ;;  %v1010_v37 = vsel %vm1006_vm3, %v1277_v34, 0.0  ;;  %v1020_v38 = vmul.f32 %v1277_v34, %v1277_v34 }
 0x10e   : >> { %v1023_v39 = vsel %vm1008_vm2, %v1021_v36, 0.0  ;;  %v1012_v40 = vadd.f32 %v1011_v35, %v1010_v37 }
 0x10f   : >> { %v1022_v41 = vsel %vm1006_vm3, %v1020_v38, 0.0 }
 0x110   : >> { %v1013_v42 = vrot.slane %v1012_v40, 4  ;;  %v1024_v43 = vadd.f32 %v1023_v39, %v1022_v41 }
 0x112   : >> { %v1014_v44 = vadd.f32 %v1013_v42, %v1012_v40  ;;  %v1025_v45 = vrot.slane %v1024_v43, 4 }
 0x114   : >> { %v1015_v46 = vrot.slane %v1014_v44, 2  ;;  %v1026_v47 = vadd.f32 %v1025_v45, %v1024_v43 }
 0x116   : >> { %v1016_v48 = vadd.f32 %v1015_v46, %v1014_v44  ;;  %v1027_v49 = vrot.slane %v1026_v47, 2 }
 0x118   : >> { %v1017_v50 = vrot.slane %v1016_v48, 1  ;;  %v1028_v51 = vadd.f32 %v1027_v49, %v1026_v47 }
 0x11a   : >> { %v1018_v52 = vadd.f32 %v1017_v50, %v1016_v48  ;;  %v1029_v53 = vrot.slane %v1028_v51, 1  ;;  %186 = sbr.rel (!%p184_p4) target bundleno = 17 (0x11), region = 89 }
 0x11c   : >> { %v1019_v54 = vadd.f32 %v1351_v1, %v1018_v52   ;;  %v1030_v55 = vadd.f32 %v1029_v53, %v1028_v51 }
 0x11e   : >> { %v1031_v56 = vadd.f32 %v1347_v0, %v1030_v55   ;;  %v1524_v1 = vmov %v1019_v54  ;;  %1033 = vst.msk [vmem:[%s1398_s25] sm:$0x1] (%p184_p4), %vm1032_vm4, %v1019_v54 }
 0x120   : >> { %v1523_v0 = vmov %v1031_v56  ;;  %1034 = vst.msk [vmem:[%s1398_s25 + $0x1] sm:$0x1] (%p184_p4), %vm1032_vm4, %v1031_v56 }
 0x121 PF: > { %s14_s12 = sadd.s32 1, %s1343_s12  }
 0x122   : > { %p11_p5 = scmp.ge.s32.totalorder %s14_s12, 4  }
 0x124   :  { %13 = sbr.rel (!%p11_p5) target bundleno = 1 (0x1), region = 100 }

// kernel: double_conv_orig_forward.4
= control target key start
LH: loop header
LB: loop body
LE: loop exit
PB: predicated region body
PF: predicated region fallthrough
CT: control target
= control target key end

     0   :  { %s1465_s18 = smov 0   ;;  %s1596_s0 = inlined_call_operand.vmem [shape: f32[2,14,14,8], index: 0, kind: input, shape index: {}]   ;;  %s1597_s1 = inlined_call_operand.vmem [shape: f32[1,8], index: 1, kind: input, shape index: {}]   ;;  %s1598_s2 = inlined_call_operand.vmem [shape: f32[1,8], index: 2, kind: input, shape index: {}]   ;;  %s1599_s3 = inlined_call_operand.vmem [shape: f32[3,3,8,8], index: 3, kind: input, shape index: {}]   ;;  %s1600_s4 = inlined_call_operand.vmem [shape: f32[2,12,12,8], index: 4, kind: output, shape index: {0}]   ;;  %s1601_s5 = inlined_call_operand.vmem [shape: f32[2,2,8], index: 5, kind: output, shape index: {1}]  }
   0x1 LB: > { %s1211_s19 = sadd.s32 4294967295, %s1417_s18   ;;  %p1215_p0 = scmp.ge.s32.totalorder %s1417_s18, 1  ;;  %s1417_s18 = sphi %s1465_s18, %s16_s18  }
   0x2   : > { %p190_p1 = scmp.lt.s32.totalorder %s1417_s18, 3 }
   0x4   : > { %p191_p2 = pnand %p1215_p0, %p190_p1 }
   0x5   : > { %p222_p3 = scmp.lt.s32.totalorder (!%p191_p2), %s1211_s19, 1  ;;  %v1220_v0 = vld [vmem:[%s1597_s1] ss:$0 sm:$0xff] (!%p191_p2)  ;;  %s1419_s11 = smov (!%p191_p2), 0  }
   0x6   : > { %194 = sbr.rel (%p191_p2) target bundleno = 304 (0x130), region = 36  ;;  %v1221_v1 = vld [vmem:[%s1598_s2] ss:$0 sm:$0xff] (!%p191_p2) }
   0xd   : > { %s1605_s19 = smov (!%p222_p3, %s1211_s19), 1 }
   0xe   : > { %s1353_s24 = smul.u32 224, %s1605_s19  ;;  %s1218_s25 = sshll.u32 %s1605_s19, 1 }
   0xf   : > { %s1354_s26 = smul.u32 192, %s1605_s19  ;;  %s1482_s29 = scalar_lea.vmem %s1601_s5, %s1218_s25 }
  0x10   : > { %s226_s7 = scalar_lea.vmem %s1596_s0, %s1353_s24 }
  0x11   : > { %s1490_s10 = scalar_lea.vmem %s1600_s4, %s1354_s26 }
  0x12 LB: >> { %s1219_s12 = sshll.u32 %s1421_s11, 4  ;;  %vm267_vm0 = vcmask 64512   ;;  %vm269_vm1 = vcmask 62464   ;;  %s243_s11 = sadd.s32 1, %s1421_s11   ;;  %s1421_s11 = sphi %s1419_s11, %s243_s11  }
  0x13   : >> { %s245_s13 = scalar_lea.vmem %s226_s7, %s1219_s12  ;;  %s266_s14 = scalar_lea.vmem [#allocation2], %s1219_s12 }
  0x14   : >> { %v246_v2 = vld [vmem:[%s245_s13] sm:$0xff]  ;;  %v247_v3 = vld [vmem:[%s245_s13 + $0x8] sm:$0x3f]  ;;  %p240_p4 = scmp.ge.s32.totalorder %s243_s11, 14  }
  0x15   : >> { %v254_v4 = vmul.f32 %v1220_v0, %v246_v2  ;;  %v255_v5 = vmul.f32 %v1220_v0, %v247_v3  ;;  %v1493_v10 = vmov (%p240_p4), 0.0   ;;  %v1495_v11 = vmov (%p240_p4), 0.0   ;;  %s1497_s15 = smov (%p240_p4), 0  }
  0x16   : > { %242 = sbr.rel (!%p240_p4) target bundleno = 18 (0x12), region = 106 }
  0x17   : >> { %v262_v6 = vadd.f32 %v1221_v1, %v254_v4  ;;  %v263_v7 = vadd.f32 %v1221_v1, %v255_v5 }
  0x19   : >> { %v264_v8 = vmax.f32 %v262_v6, 0.0  ;;  %v265_v9 = vmax.f32 %v263_v7, 0.0 }
  0x1b   : >> { %268 = vst.msk [vmem:[%s266_s14] sm:$0xff] %vm267_vm0, %v264_v8 }
  0x1c   : >> { %270 = vst.msk [vmem:[%s266_s14 + $0x8] sm:$0x3f] %vm269_vm1, %v265_v9 }
  0x1d LB: >> { %v1239_v12 = vld [vmem:[%s1599_s3 + $0x20] sm:$0xff]  ;;  %v1223_v13 = vld [vmem:[%s1599_s3 + $0x8] sm:$0xff]  ;;  %s1222_s25 = sshll.u32 %s1433_s15, 4  ;;  %v1250_v22 = vld [vmem:[%s1599_s3 + $0x30] sm:$0xff]  ;;  %vm1068_vm2 = vcmask 60416   ;;  %s276_s15 = sadd.s32 1, %s1433_s15   ;;  %s1433_s15 = sphi %s1497_s15, %s276_s15   ;;  %v1429_v11 = vphi %v1495_v11, %v1603_v11   ;;  %v1425_v10 = vphi %v1493_v10, %v1602_v10  }
  0x1e   : >> { %v1244_v14 = vld [vmem:[%s1599_s3 + $0x28] sm:$0xff]  ;;  %1312 = vmatprep.subr.mxu0 %v1239_v12  ;;  %1292 = vmatprep.subr.mxu1 %v1223_v13  ;;  %v283_v15 = vld [vmem:[%s1599_s3] sm:$0xff]  ;;  %s1523_s26 = scalar_lea.vmem [#allocation2], %s1222_s25  ;;  %v1228_v23 = vld [vmem:[%s1599_s3 + $0x10] sm:$0xff]  ;;  %s1066_s14 = scalar_lea.vmem %s1490_s10, %s1222_s25 }
  0x1f   : >> { %1313 = vmatpush3.msra.mxu0 %v1239_v12  ;;  %1293 = vmatpush3.msra.mxu1 %v1223_v13  ;;  %v1255_v28 = vld [vmem:[%s1599_s3 + $0x38] sm:$0xff]  ;;  %v1260_v34 = vld [vmem:[%s1599_s3 + $0x40] sm:$0xff]  ;;  %p273_p5 = scmp.ge.s32.totalorder %s276_s15, 12  }
  0x20   : >> { %1317 = vmatprep.subr.mxu0 %v1244_v14  ;;  %1297 = vmatprep.subr.mxu1 %v283_v15  ;;  %v1234_v29 = vld [vmem:[%s1599_s3 + $0x18] sm:$0xff]  ;;  %vm1092_vm3 = vcmask (%p273_p5), 57344  }
  0x23   : >> { %v284_v16 = vld [vmem:[%s1523_s26 + $0x1] sm:$0xff]  ;;  %v1237_v17 = vld [vmem:[%s1523_s26 + $0x11] sm:$0xff]  ;;  %v285_v18 = vld [vmem:[%s1523_s26 + $0x9] sm:$0xf] }
  0x24   : >> { %1294 = vmatprep.mubr.msk.f32.mxu1 %vm267_vm0, %v284_v16  ;;  %1314 = vmatprep.mubr.msk.f32.mxu0 %vm267_vm0, %v1237_v17  ;;  %v1238_v19 = vld [vmem:[%s1523_s26 + $0x19] sm:$0xf]  ;;  %v281_v20 = vld [vmem:[%s1523_s26] sm:$0xff]  ;;  %v282_v24 = vld [vmem:[%s1523_s26 + $0x8] sm:$0xf] }
  0x25   : >> { %v1242_v21 = vld [vmem:[%s1523_s26 + $0x12] sm:$0xff]  ;;  %1295 = vmatmul.mubr.msk.f32.vlgmr.msra.gmra.mrb[0].mxu1 %vm267_vm0, %v285_v18  ;;  %1315 = vmatmul.mubr.msk.f32.vlgmr.msra.gmra.mrb[0].mxu0 %vm267_vm0, %v1238_v19  ;;  %v1243_v25 = vld [vmem:[%s1523_s26 + $0x1a] sm:$0xf]  ;;  %v451_v26 = vld [vmem:[%s1523_s26 + $0x2] sm:$0xff] }
  0x26   : >> { %1318 = vmatpush3.msra.mxu0 %v1244_v14  ;;  %1298 = vmatpush3.msra.mxu1 %v283_v15  ;;  %v1248_v27 = vld [vmem:[%s1523_s26 + $0x20] sm:$0xff]  ;;  %v452_v30 = vld [vmem:[%s1523_s26 + $0xa] sm:$0xf]  ;;  %v1232_v32 = vld [vmem:[%s1523_s26 + $0x10] sm:$0xff] }
  0x27   : >> { %1299 = vmatprep.mubr.msk.f32.mxu1 %vm267_vm0, %v281_v20  ;;  %1319 = vmatprep.mubr.msk.f32.mxu0 %vm267_vm0, %v1242_v21  ;;  %v1249_v31 = vld [vmem:[%s1523_s26 + $0x28] sm:$0xf]  ;;  %v1233_v35 = vld [vmem:[%s1523_s26 + $0x18] sm:$0xf] }
  0x28   : >> { %1322 = vmatprep.subr.mxu0 %v1250_v22  ;;  %1302 = vmatprep.subr.mxu1 %v1228_v23  ;;  %v1253_v33 = vld [vmem:[%s1523_s26 + $0x21] sm:$0xff]  ;;  %v1254_v36 = vld [vmem:[%s1523_s26 + $0x29] sm:$0xf] }
  0x29   : >> { %v1258_v37 = vld [vmem:[%s1523_s26 + $0x22] sm:$0xff]  ;;  %v1259_v38 = vld [vmem:[%s1523_s26 + $0x2a] sm:$0xf] }
  0x2d   : >> { %1300 = vmatmul.mubr.msk.f32.vlgmr.msra.gmra.mrb[0].mxu1 %vm267_vm0, %v282_v24  ;;  %1320 = vmatmul.mubr.msk.f32.vlgmr.msra.gmra.mrb[0].mxu0 %vm267_vm0, %v1243_v25 }
  0x2e   : >> { %1323 = vmatpush3.msra.mxu0 %v1250_v22  ;;  %1303 = vmatpush3.msra.mxu1 %v1228_v23 }
  0x2f   : >> { %1304 = vmatprep.mubr.msk.f32.mxu1 %vm267_vm0, %v451_v26  ;;  %1324 = vmatprep.mubr.msk.f32.mxu0 %vm267_vm0, %v1248_v27 }
  0x30   : >> { %1327 = vmatprep.subr.mxu0 %v1255_v28  ;;  %1307 = vmatprep.subr.mxu1 %v1234_v29 }
  0x35   : >> { %1305 = vmatmul.mubr.msk.f32.vlgmr.msra.gmra.mrb[0].mxu1 %vm267_vm0, %v452_v30  ;;  %1325 = vmatmul.mubr.msk.f32.vlgmr.msra.gmra.mrb[0].mxu0 %vm267_vm0, %v1249_v31 }
  0x36   : >> { %1328 = vmatpush3.msra.mxu0 %v1255_v28  ;;  %1308 = vmatpush3.msra.mxu1 %v1234_v29 }
  0x37   : >> { %1309 = vmatprep.mubr.msk.f32.mxu1 %vm267_vm0, %v1232_v32  ;;  %1329 = vmatprep.mubr.msk.f32.mxu0 %vm267_vm0, %v1253_v33 }
  0x38   : >> { %1332 = vmatprep.subr.mxu0 %v1260_v34 }
  0x3d   : >> { %1310 = vmatmul.mubr.msk.f32.vlgmr.msra.gmra.mrb[0].mxu1 %vm267_vm0, %v1233_v35  ;;  %1330 = vmatmul.mubr.msk.f32.vlgmr.msra.gmra.mrb[0].mxu0 %vm267_vm0, %v1254_v36 }
  0x3e   : >> { %1333 = vmatpush3.msra.mxu0 %v1260_v34  ;;  %1334 = vmatprep.mubr.msk.f32.mxu0 %vm267_vm0, %v1258_v37 }
  0x45   : >> { %1335 = vmatmul.mubr.msk.f32.vlgmr.msra.gmra.mrb[0].mxu0 %vm267_vm0, %v1259_v38 }
 0x110   : >> { %v1311_v39 = vpop.f32.mrb[0].mxu1 }
 0x111   : >> { %v617_v40 = vpop.f32.mrb[1].mxu1 }
 0x118   : >> { %v1336_v41 = vpop.f32.mrb[0].mxu0 }
 0x119   : >> { %v1337_v42 = vadd.f32 %v1336_v41, %v1311_v39  ;;  %v1055_v43 = vpop.f32.mrb[1].mxu0 }
 0x11a   : >> { %v1338_v44 = vadd.f32 %v1055_v43, %v617_v40 }
 0x11b   : >> { %1069 = vst.msk [vmem:[%s1066_s14 + $0x8] sm:$0xf] %vm1068_vm2, %v1337_v42  ;;  %v1071_v45 = vsel %vm1068_vm2, %v1337_v42, 0.0  ;;  %v1081_v46 = vmul.f32 %v1337_v42, %v1337_v42 }
 0x11c   : >> { %1067 = vst.msk [vmem:[%s1066_s14] sm:$0xff] %vm267_vm0, %v1338_v44  ;;  %v1070_v47 = vsel %vm267_vm0, %v1338_v44, 0.0  ;;  %v1080_v48 = vmul.f32 %v1338_v44, %v1338_v44 }
 0x11d   : >> { %v1083_v49 = vsel %vm1068_vm2, %v1081_v46, 0.0  ;;  %v1072_v50 = vadd.f32 %v1071_v45, %v1070_v47 }
 0x11e   : >> { %v1082_v51 = vsel %vm267_vm0, %v1080_v48, 0.0 }
 0x11f   : >> { %v1073_v52 = vrot.slane %v1072_v50, 4  ;;  %v1084_v53 = vadd.f32 %v1083_v49, %v1082_v51 }
 0x121   : >> { %v1074_v54 = vadd.f32 %v1073_v52, %v1072_v50  ;;  %v1085_v55 = vrot.slane %v1084_v53, 4 }
 0x123   : >> { %v1075_v56 = vrot.slane %v1074_v54, 2  ;;  %v1086_v57 = vadd.f32 %v1085_v55, %v1084_v53 }
 0x125   : >> { %v1076_v58 = vadd.f32 %v1075_v56, %v1074_v54  ;;  %v1087_v59 = vrot.slane %v1086_v57, 2 }
 0x127   : >> { %v1077_v60 = vrot.slane %v1076_v58, 1  ;;  %v1088_v61 = vadd.f32 %v1087_v59, %v1086_v57 }
 0x129   : >> { %v1078_v62 = vadd.f32 %v1077_v60, %v1076_v58  ;;  %v1089_v63 = vrot.slane %v1088_v61, 1  ;;  %275 = sbr.rel (!%p273_p5) target bundleno = 29 (0x1d), region = 117 }
 0x12b   : >> { %v1079_v0 = vadd.f32 %v1429_v11, %v1078_v62   ;;  %v1090_v1 = vadd.f32 %v1089_v63, %v1088_v61 }
 0x12d   : >> { %v1091_v2 = vadd.f32 %v1425_v10, %v1090_v1   ;;  %v1603_v11 = vmov %v1079_v0  ;;  %1093 = vst.msk [vmem:[%s1482_s29] sm:$0x1] (%p273_p5), %vm1092_vm3, %v1079_v0 }
 0x12f   : >> { %v1602_v10 = vmov %v1091_v2  ;;  %1094 = vst.msk [vmem:[%s1482_s29 + $0x1] sm:$0x1] (%p273_p5), %vm1092_vm3, %v1091_v2 }
 0x130 PF: > { %s16_s18 = sadd.s32 1, %s1417_s18  }
 0x131   : > { %p13_p6 = scmp.ge.s32.totalorder %s16_s18, 4  }
 0x133   :  { %15 = sbr.rel (!%p13_p6) target bundleno = 1 (0x1), region = 128 }

</bundles_post_ra>
